<compile_context>
chip_gen: v7x
topology: tpu7x:2x2x1
jax: 0.10.0
libtpu: 0.0.40
codegen_flags: <defaults>
</compile_context>

<pallas_src>
import functools

import numpy as np
import jax
import jax.numpy as jnp
from jax import lax
from jax.experimental import pallas as pl
from jax.experimental.pallas import tpu as pltpu


def _round_up(x, m):
    return ((x + m - 1) // m) * m


def _npair_loss_kernel(nvalid_ref, a_ref, pool_ref, out_ref, *, l2_reg, tm, mask_pad):
    """Per-tile partial:  sum_i lse_i + l2_reg * sum_i(|a_i|^2 + |p_i|^2),
    written (broadcast) into this tile's (1, 8, 128) output block."""
    pid = pl.program_id(0)
    n_valid = nvalid_ref[0]                       # dynamic pair count (SMEM scalar)

    a = a_ref[...]                                # (tm, D)   anchor row tile
    pool = pool_ref[...]                          # (n_pad,D) all positives == negative pool
    row0 = pl.multiple_of(pid * tm, tm)
    p = pool_ref[pl.ds(row0, tm), :]              # (tm, D)   positives of this tile (no 2nd DMA stream)

    # Gram tile on the MXU, f32 accumulation: G[r, j] = a_r . p_j  -> (tm, n_pad)
    g = lax.dot_general(a, pool, (((1,), (1,)), ((), ())),
                        preferred_element_type=jnp.float32)

    if mask_pad:
        # zero-padded pool rows must not contribute to the logsumexp
        col_ids = lax.broadcasted_iota(jnp.int32, (1, g.shape[1]), 1)
        g = g + jnp.where(col_ids < n_valid, 0.0, -1e30).astype(jnp.float32)

    a32 = a.astype(jnp.float32)
    p32 = p.astype(jnp.float32)

    # diag[r] = G[r, r] = a_r . p_r   (cheap per-row VPU dot, no (tm,n) select)
    diag = jnp.sum(a32 * p32, axis=1, keepdims=True)             # (tm, 1)

    # logsumexp_j(G[r, j] - diag[r]) with the diag correction folded into the
    # epilogue: lse = (m - diag) + log(sum exp(g - m))
    m = jnp.max(g, axis=1, keepdims=True)                        # (tm, 1)
    s = jnp.sum(jnp.exp(g - m), axis=1, keepdims=True)           # (tm, 1)
    lse = (m - diag) + jnp.log(s)                                # (tm, 1)

    if mask_pad:
        # zero-padded anchor rows produce lse = log(n); mask them out
        row_ids = row0 + lax.broadcasted_iota(jnp.int32, (tm, 1), 0)
        lse = jnp.where(row_ids < n_valid, lse, 0.0)

    # L2 term: padded rows are exactly zero, so no mask is needed here.
    sq = jnp.sum(a32 * a32 + p32 * p32)

    part = jnp.sum(lse) + jnp.float32(l2_reg) * sq
    out_ref[...] = jnp.full((1, 8, 128), part, dtype=jnp.float32)


def npair_loss_pallas(anchors, positives, l2_reg=0.02, *, row_tile=128,
                      matmul_dtype=None):
    """N-pair loss + l2_reg * l2 for gathered anchor/positive rows (n, D).

    Negatives are implicit (all positives j != i), so only the two (n, D)
    matrices are moved; the positives matrix is moved exactly once (it serves
    as both the resident negative pool and the per-tile positive rows).

    row_tile: 128 is safe everywhere; 256 better saturates the 2x256x256 MXU
    on v6e/v7x for large n (re-check the VMEM budget on v7x).
    matmul_dtype: set to jnp.bfloat16 to feed the MXU bf16 operands (~3x MXU
    throughput, half the pool footprint) at reduced precision; None keeps the
    original f32 semantics.
    """
    n, d = anchors.shape
    tm = min(int(row_tile), _round_up(n, 8))     # row tile, sublane-aligned
    n_pad = _round_up(n, tm)
    num_tiles = n_pad // tm
    mask_pad = n_pad != n

    if matmul_dtype is not None:
        anchors = anchors.astype(matmul_dtype)
        positives = positives.astype(matmul_dtype)

    if mask_pad:                                  # pad only when actually needed
        pad = ((0, n_pad - n), (0, 0))
        anchors = jnp.pad(anchors, pad)
        positives = jnp.pad(positives, pad)

    n_valid = jnp.array([n], dtype=jnp.int32)     # scalar-prefetch arg (no recompile per n)

    kernel = functools.partial(_npair_loss_kernel, l2_reg=float(l2_reg),
                               tm=tm, mask_pad=mask_pad)

    # VMEM budget (worst case: pool double-buffered) and advisory cost estimate.
    itemsize = jnp.dtype(anchors.dtype).itemsize
    d_lane = _round_up(d, 128)
    n_lane = _round_up(n_pad, 128)
    vmem_est = (2 * n_pad * d_lane * itemsize       # resident pool (<=2 buffers)
                + 2 * tm * d_lane * itemsize        # anchor tile double buffer
                + 4 * tm * n_lane * 4               # (tm, n_pad) f32 Gram + temporaries
                + 4 * 8 * 128 * 4)                  # partial-sum output blocks
    vmem_limit = int(min(128 << 20, max(32 << 20, vmem_est + (4 << 20))))
    cost = pl.CostEstimate(
        flops=2 * n_pad * n_pad * d,
        transcendentals=n_pad * n_pad,
        bytes_accessed=2 * n_pad * d * itemsize + num_tiles * 8 * 128 * 4,
    )

    def build(single_buffer_pool):
        pool_kwargs = {}
        if single_buffer_pool:
            # constant index_map -> one resident copy is enough (halves pool VMEM)
            pool_kwargs["pipeline_mode"] = pl.Buffered(1)
        grid_spec = pltpu.PrefetchScalarGridSpec(
            num_scalar_prefetch=1,
            grid=(num_tiles,),
            in_specs=[
                pl.BlockSpec((tm, d), lambda i, nv: (i, 0)),          # anchor row tile
                pl.BlockSpec((n_pad, d), lambda i, nv: (0, 0),        # full positives pool
                             **pool_kwargs),
            ],
            out_specs=pl.BlockSpec((1, 8, 128), lambda i, nv: (i, 0, 0)),
        )
        return pl.pallas_call(
            kernel,
            out_shape=jax.ShapeDtypeStruct((num_tiles, 8, 128), jnp.float32),
            grid_spec=grid_spec,
            compiler_params=pltpu.CompilerParams(
                dimension_semantics=("parallel",),       # independent tiles -> both TCs on v7x
                vmem_limit_bytes=vmem_limit),
            cost_estimate=cost,
        )

    try:
        partials = build(True)(n_valid, anchors, positives)
    except Exception:  # pipeline_mode=Buffered(1) unsupported -> default buffering
        partials = build(False)(n_valid, anchors, positives)

    # final mean over pairs; the /n of the L2 term shares the same divisor
    return jnp.sum(partials[:, 0, 0]) / jnp.float32(n)


def get_n_pairs(labels, rng):
    """Host-side replica of NPairLoss.get_n_pairs (uses np.random.choice)."""
    labels = np.asarray(labels)
    n_pairs = []
    for label in sorted(set(labels.tolist())):
        label_indices = np.where(labels == label)[0]
        if len(label_indices) < 2:
            continue
        anchor, positive = rng.choice(label_indices, 2, replace=False)
        n_pairs.append([anchor, positive])
    n_pairs = np.array(n_pairs)
    n_negatives = []
    for i in range(len(n_pairs)):
        negative = np.concatenate([n_pairs[:i, 1], n_pairs[i + 1:, 1]])
        n_negatives.append(negative)
    n_negatives = np.array(n_negatives)
    return n_pairs, n_negatives


def npair_loss_forward(embeddings, target, l2_reg=0.02, seed=0):
    # index selection (host-side glue, matches the torch module's numpy path)
    rng = np.random.RandomState(seed)
    n_pairs, _ = get_n_pairs(target, rng)
    anchors = embeddings[n_pairs[:, 0]]        # (n, d)
    positives = embeddings[n_pairs[:, 1]]      # (n, d)
    return npair_loss_pallas(anchors, positives, l2_reg)


def _reference_loss(anchors, positives, negatives, l2_reg):
    """Pure-JAX replica of the original torch formulation (negatives tensor)."""
    a = anchors.astype(jnp.float32)
    p = positives.astype(jnp.float32)
    neg = negatives.astype(jnp.float32)
    x = jnp.einsum("nd,nkd->nk", a, neg - p[:, None, :])
    loss_np = jnp.mean(jnp.log(1.0 + jnp.sum(jnp.exp(x), axis=1)))
    loss_l2 = jnp.sum(a * a + p * p) / a.shape[0]
    return loss_np + l2_reg * loss_l2


if __name__ == "__main__":
    key = jax.random.PRNGKey(0)
    N, D = 16, 32                        # 16 embeddings of hidden size 32
    embeddings = jax.random.normal(key, (N, D), dtype=jnp.float32) * 0.1
    target = np.repeat(np.arange(8), 2)  # 8 classes x 2 samples -> n = 8 pairs

    l2_reg = 0.02
    loss = npair_loss_forward(embeddings, target, l2_reg=l2_reg, seed=0)
    loss = jax.block_until_ready(loss)

    rng = np.random.RandomState(0)
    n_pairs, n_negatives = get_n_pairs(target, rng)
    ref = _reference_loss(embeddings[n_pairs[:, 0]], embeddings[n_pairs[:, 1]],
                          embeddings[n_negatives], l2_reg)
    assert np.allclose(np.asarray(loss), np.asarray(ref), rtol=1e-4, atol=1e-4), (loss, ref)

    # also exercise the padded / column-masked path (n not a multiple of 8)
    emb2 = jax.random.normal(jax.random.PRNGKey(1), (22, D), dtype=jnp.float32) * 0.1
    target2 = np.repeat(np.arange(11), 2)            # 11 pairs -> pads to 16
    loss2 = npair_loss_forward(emb2, target2, l2_reg=l2_reg, seed=1)
    loss2 = jax.block_until_ready(loss2)
    rng2 = np.random.RandomState(1)
    pairs2, negs2 = get_n_pairs(target2, rng2)
    ref2 = _reference_loss(emb2[pairs2[:, 0]], emb2[pairs2[:, 1]], emb2[negs2], l2_reg)
    assert np.allclose(np.asarray(loss2), np.asarray(ref2), rtol=1e-4, atol=1e-4), (loss2, ref2)

    print("KERNEL_OK")
</pallas_src>

<mosaic_0001>
module attributes {stable_mosaic.version = 11 : i64} {
  func.func @_npair_loss_kernel(%arg0: i32, %arg1: memref<1xi32, #tpu.memory_space<smem>>, %arg2: memref<8x32xf32, #tpu.memory_space<vmem>>, %arg3: memref<8x32xf32, #tpu.memory_space<vmem>>, %arg4: memref<1x8x128xf32, #tpu.memory_space<vmem>>) attributes {dimension_semantics = [#tpu.dimension_semantics<parallel>], iteration_bounds = array<i64: 1>, scalar_prefetch = 1 : i64, scratch_operands = 0 : i64, tpu.core_type = #tpu.core_type<tc>, window_params = [{transform_indices = @transform_0, window_bounds = array<i64: 8, 32>}, {pipeline_mode = #tpu.pipeline_mode<synchronous>, transform_indices = @transform_1, window_bounds = array<i64: 8, 32>}, {transform_indices = @transform_2, window_bounds = array<i64: 1, 8, 128>}]} {
    %c0 = arith.constant 0 : index
    %c0_0 = arith.constant 0 : index
    %0 = vector.load %arg2[%c0, %c0_0] : memref<8x32xf32, #tpu.memory_space<vmem>>, vector<8x32xf32>
    %c0_1 = arith.constant 0 : index
    %c0_2 = arith.constant 0 : index
    %1 = vector.load %arg3[%c0_1, %c0_2] : memref<8x32xf32, #tpu.memory_space<vmem>>, vector<8x32xf32>
    %c8_i32 = arith.constant 8 : i32
    %2 = arith.muli %arg0, %c8_i32 : i32
    %3 = tpu.assume_multiple %2, 8 : i32
    %4 = arith.index_cast %3 : i32 to index
    %c0_3 = arith.constant 0 : index
    %5 = vector.load %arg3[%4, %c0_3] : memref<8x32xf32, #tpu.memory_space<vmem>>, vector<8x32xf32>
    %cst = arith.constant dense<0.000000e+00> : vector<8x8xf32>
    %6 = tpu.matmul %0, %1, %cst {dimension_numbers = #tpu.dot_dimension_numbers<[1], [1], [0], [0], [0, 0, 1, 0], [], []>} : vector<8x32xf32>, vector<8x32xf32>, vector<8x8xf32> -> vector<8x8xf32>
    %7 = arith.mulf %0, %5 : vector<8x32xf32>
    %cst_4 = arith.constant dense<0.000000e+00> : vector<8xf32>
    %8 = vector.multi_reduction <add>, %7, %cst_4 [1] : vector<8x32xf32> to vector<8xf32>
    %9 = vector.shape_cast %8 : vector<8xf32> to vector<8x1xf32>
    %cst_5 = arith.constant dense<0xFF800000> : vector<8xf32>
    %10 = vector.multi_reduction <maximumf>, %6, %cst_5 [1] : vector<8x8xf32> to vector<8xf32>
    %11 = vector.shape_cast %10 : vector<8xf32> to vector<8x1xf32>
    %12 = vector.broadcast %11 : vector<8x1xf32> to vector<8x8xf32>
    %13 = arith.subf %6, %12 : vector<8x8xf32>
    %14 = math.exp %13 : vector<8x8xf32>
    %cst_6 = arith.constant dense<0.000000e+00> : vector<8xf32>
    %15 = vector.multi_reduction <add>, %14, %cst_6 [1] : vector<8x8xf32> to vector<8xf32>
    %16 = vector.shape_cast %15 : vector<8xf32> to vector<8x1xf32>
    %17 = arith.subf %11, %9 : vector<8x1xf32>
    %18 = math.log %16 : vector<8x1xf32>
    %19 = arith.addf %17, %18 : vector<8x1xf32>
    %20 = arith.mulf %0, %0 : vector<8x32xf32>
    %21 = arith.mulf %5, %5 : vector<8x32xf32>
    %22 = arith.addf %20, %21 : vector<8x32xf32>
    %23 = vector.shape_cast %22 : vector<8x32xf32> to vector<1x8x32xf32>
    %cst_7 = arith.constant dense<0.000000e+00> : vector<1xf32>
    %24 = vector.multi_reduction <add>, %23, %cst_7 [1, 2] : vector<1x8x32xf32> to vector<1xf32>
    %25 = vector.shape_cast %24 : vector<1xf32> to vector<1x1x1xf32>
    %26 = vector.extract %25[0, 0, 0] : f32 from vector<1x1x1xf32>
    %27 = vector.shape_cast %19 : vector<8x1xf32> to vector<1x8x1xf32>
    %cst_8 = arith.constant dense<0.000000e+00> : vector<1xf32>
    %28 = vector.multi_reduction <add>, %27, %cst_8 [1, 2] : vector<1x8x1xf32> to vector<1xf32>
    %29 = vector.shape_cast %28 : vector<1xf32> to vector<1x1x1xf32>
    %30 = vector.extract %29[0, 0, 0] : f32 from vector<1x1x1xf32>
    %cst_9 = arith.constant 2.000000e-02 : f32
    %31 = arith.mulf %cst_9, %26 : f32
    %32 = arith.addf %30, %31 : f32
    %33 = vector.broadcast %32 : f32 to vector<1x8x128xf32>
    %c0_10 = arith.constant 0 : index
    %c0_11 = arith.constant 0 : index
    %c0_12 = arith.constant 0 : index
    %34 = vector.load %arg4[%c0_10, %c0_11, %c0_12] : memref<1x8x128xf32, #tpu.memory_space<vmem>>, vector<1x8x128xf32>
    tpu.vector_store %arg4[%c0_10, %c0_11, %c0_12], %33 {strides = array<i32>} : memref<1x8x128xf32, #tpu.memory_space<vmem>>, vector<1x8x128xf32>,
    return
  }
  func.func @transform_0(%arg0: i32, %arg1: memref<1xi32, #tpu.memory_space<smem>>) -> (i32, i32) {
    %c0_i32 = arith.constant 0 : i32
    %c0_i32_0 = arith.constant 0 : i32
    return %arg0, %c0_i32 : i32, i32
  }
  func.func @transform_1(%arg0: i32, %arg1: memref<1xi32, #tpu.memory_space<smem>>) -> (i32, i32) {
    %c0_i32 = arith.constant 0 : i32
    %c0_i32_0 = arith.constant 0 : i32
    %c0_i32_1 = arith.constant 0 : i32
    return %c0_i32, %c0_i32_0 : i32, i32
  }
  func.func @transform_2(%arg0: i32, %arg1: memref<1xi32, #tpu.memory_space<smem>>) -> (i32, i32, i32) {
    %c0_i32 = arith.constant 0 : i32
    %c0_i32_0 = arith.constant 0 : i32
    %c0_i32_1 = arith.constant 0 : i32
    return %arg0, %c0_i32, %c0_i32_0 : i32, i32, i32
  }
}

module attributes {stable_mosaic.version = 11 : i64} {
  func.func @_npair_loss_kernel(%arg0: i32, %arg1: memref<1xi32, #tpu.memory_space<smem>>, %arg2: memref<8x32xf32, #tpu.memory_space<vmem>>, %arg3: memref<8x32xf32, #tpu.memory_space<vmem>>, %arg4: memref<1x8x128xf32, #tpu.memory_space<vmem>>) attributes {dimension_semantics = [#tpu.dimension_semantics<parallel>], iteration_bounds = array<i64: 1>, scalar_prefetch = 1 : i64, scratch_operands = 0 : i64, tpu.core_type = #tpu.core_type<tc>, window_params = [{transform_indices = @transform_0, window_bounds = array<i64: 8, 32>}, {pipeline_mode = #tpu.pipeline_mode<synchronous>, transform_indices = @transform_1, window_bounds = array<i64: 8, 32>}, {transform_indices = @transform_2, window_bounds = array<i64: 1, 8, 128>}]} {
    %c0 = arith.constant 0 : index
    %c0_0 = arith.constant 0 : index
    %0 = vector.load %arg2[%c0, %c0_0] : memref<8x32xf32, #tpu.memory_space<vmem>>, vector<8x32xf32>
    %c0_1 = arith.constant 0 : index
    %c0_2 = arith.constant 0 : index
    %1 = vector.load %arg3[%c0_1, %c0_2] : memref<8x32xf32, #tpu.memory_space<vmem>>, vector<8x32xf32>
    %c8_i32 = arith.constant 8 : i32
    %2 = arith.muli %arg0, %c8_i32 : i32
    %3 = tpu.assume_multiple %2, 8 : i32
    %4 = arith.index_cast %3 : i32 to index
    %c0_3 = arith.constant 0 : index
    %5 = vector.load %arg3[%4, %c0_3] : memref<8x32xf32, #tpu.memory_space<vmem>>, vector<8x32xf32>
    %cst = arith.constant dense<0.000000e+00> : vector<8x8xf32>
    %6 = tpu.matmul %0, %1, %cst {dimension_numbers = #tpu.dot_dimension_numbers<[1], [1], [0], [0], [0, 0, 1, 0], [], []>} : vector<8x32xf32>, vector<8x32xf32>, vector<8x8xf32> -> vector<8x8xf32>
    %7 = arith.mulf %0, %5 : vector<8x32xf32>
    %cst_4 = arith.constant dense<0.000000e+00> : vector<8xf32>
    %8 = vector.multi_reduction <add>, %7, %cst_4 [1] : vector<8x32xf32> to vector<8xf32>
    %9 = vector.shape_cast %8 : vector<8xf32> to vector<8x1xf32>
    %cst_5 = arith.constant dense<0xFF800000> : vector<8xf32>
    %10 = vector.multi_reduction <maximumf>, %6, %cst_5 [1] : vector<8x8xf32> to vector<8xf32>
    %11 = vector.shape_cast %10 : vector<8xf32> to vector<8x1xf32>
    %12 = vector.broadcast %11 : vector<8x1xf32> to vector<8x8xf32>
    %13 = arith.subf %6, %12 : vector<8x8xf32>
    %14 = math.exp %13 : vector<8x8xf32>
    %cst_6 = arith.constant dense<0.000000e+00> : vector<8xf32>
    %15 = vector.multi_reduction <add>, %14, %cst_6 [1] : vector<8x8xf32> to vector<8xf32>
    %16 = vector.shape_cast %15 : vector<8xf32> to vector<8x1xf32>
    %17 = arith.subf %11, %9 : vector<8x1xf32>
    %18 = math.log %16 : vector<8x1xf32>
    %19 = arith.addf %17, %18 : vector<8x1xf32>
    %20 = arith.mulf %0, %0 : vector<8x32xf32>
    %21 = arith.mulf %5, %5 : vector<8x32xf32>
    %22 = arith.addf %20, %21 : vector<8x32xf32>
    %23 = vector.shape_cast %22 : vector<8x32xf32> to vector<1x8x32xf32>
    %cst_7 = arith.constant dense<0.000000e+00> : vector<1xf32>
    %24 = vector.multi_reduction <add>, %23, %cst_7 [1, 2] : vector<1x8x32xf32> to vector<1xf32>
    %25 = vector.shape_cast %24 : vector<1xf32> to vector<1x1x1xf32>
    %26 = vector.extract %25[0, 0, 0] : f32 from vector<1x1x1xf32>
    %27 = vector.shape_cast %19 : vector<8x1xf32> to vector<1x8x1xf32>
    %cst_8 = arith.constant dense<0.000000e+00> : vector<1xf32>
    %28 = vector.multi_reduction <add>, %27, %cst_8 [1, 2] : vector<1x8x1xf32> to vector<1xf32>
    %29 = vector.shape_cast %28 : vector<1xf32> to vector<1x1x1xf32>
    %30 = vector.extract %29[0, 0, 0] : f32 from vector<1x1x1xf32>
    %cst_9 = arith.constant 2.000000e-02 : f32
    %31 = arith.mulf %cst_9, %26 : f32
    %32 = arith.addf %30, %31 : f32
    %33 = vector.broadcast %32 : f32 to vector<1x8x128xf32>
    %c0_10 = arith.constant 0 : index
    %c0_11 = arith.constant 0 : index
    %c0_12 = arith.constant 0 : index
    %34 = vector.load %arg4[%c0_10, %c0_11, %c0_12] : memref<1x8x128xf32, #tpu.memory_space<vmem>>, vector<1x8x128xf32>
    tpu.vector_store %arg4[%c0_10, %c0_11, %c0_12], %33 {strides = array<i32>} : memref<1x8x128xf32, #tpu.memory_space<vmem>>, vector<1x8x128xf32>,
    return
  }
  func.func @transform_0(%arg0: i32, %arg1: memref<1xi32, #tpu.memory_space<smem>>) -> (i32, i32) {
    %c0_i32 = arith.constant 0 : i32
    %c0_i32_0 = arith.constant 0 : i32
    return %arg0, %c0_i32 : i32, i32
  }
  func.func @transform_1(%arg0: i32, %arg1: memref<1xi32, #tpu.memory_space<smem>>) -> (i32, i32) {
    %c0_i32 = arith.constant 0 : i32
    %c0_i32_0 = arith.constant 0 : i32
    %c0_i32_1 = arith.constant 0 : i32
    return %c0_i32, %c0_i32_0 : i32, i32
  }
  func.func @transform_2(%arg0: i32, %arg1: memref<1xi32, #tpu.memory_space<smem>>) -> (i32, i32, i32) {
    %c0_i32 = arith.constant 0 : i32
    %c0_i32_0 = arith.constant 0 : i32
    %c0_i32_1 = arith.constant 0 : i32
    return %arg0, %c0_i32, %c0_i32_0 : i32, i32, i32
  }
}

</mosaic_0001>

<bundles_post_ra>
// kernel: tpu_custom_call.1
= control target key start
LH: loop header
LB: loop body
LE: loop exit
PB: predicated region body
PF: predicated region fallthrough
CT: control target
= control target key end

     0   :  { %9 = vsyncpa [#allocation5], 0  ;;  %s341_s0 = inlined_call_operand.<no memory space> [shape: s32[1], index: 0, kind: input, shape index: {}]   ;;  %s342_s1 = inlined_call_operand.hbm [shape: f32[8,32], index: 1, kind: input, shape index: {}]   ;;  %s343_s2 = inlined_call_operand.hbm [shape: f32[8,32], index: 2, kind: input, shape index: {}]   ;;  %s344_s3 = inlined_call_operand.hbm [shape: f32[1,8,128], index: 3, kind: output, shape index: {}]  }
   0x1   :  { %10 = vsyncpa [#allocation8], 0 }
   0x2   :  { %11 = vsyncpa [#allocation6], 0  ;;  %s276_s12 = smov [#allocation4]   ;;  %s277_s14 = smov [#allocation7]  }
   0x3   :  { %s18_s13 = sshll.u32 %s276_s12, 4  ;;  %s28_s15 = sshll.u32 %s277_s14, 4  ;;  %s19_s13 = int_to_ptr.vmem [resolvable:$true] %s18_s13  ;;  %s29_s15 = int_to_ptr.vmem [resolvable:$true] %s28_s15 }
   0x4   :  { %s204_s17 = scalar_lea.hbm %s342_s1, 128 }
   0x5   :  { %p205_p0 = scmp.ne.s32.totalorder %s342_s1, %s204_s17  ;;  %p208_p1 = scmp.lt.u32.totalorder %s204_s17, %s342_s1 }
   0x7   :  { %p210_p2 = pnand %p208_p1, %p205_p0 }
   0x9   :  { %213 = shalt.err (!%p210_p2)
}
   0xa   :  { %s214_s22 = scalar_lea.vmem %s19_s13, 128  ;;  %p219_p4 = scmp.lt.s32.totalorder %s19_s13, %s19_s13 }
   0xb   :  { %p215_p3 = scmp.ne.s32.totalorder %s19_s13, %s214_s22  ;;  %p220_p5 = scmp.lt.s32.totalorder %s214_s22, %s214_s22 }
   0xd   :  { %p221_p6 = por %p220_p5, %p219_p4 }
   0xf   :  { %p222_p7 = pnand %p221_p6, %p215_p3 }
  0x11   :  { %225 = shalt.err (!%p222_p7)
}
  0x12   :  { %21 = dma.hbm_to_vmem [thread:$0]  %s342_s1, 128, %s19_s13, [#allocation5]  }
  0x13   :  { %s226_s27 = scalar_lea.hbm %s343_s2, 128 }
  0x14   :  { %p227_p8 = scmp.ne.s32.totalorder %s343_s2, %s226_s27  ;;  %p230_p9 = scmp.lt.u32.totalorder %s226_s27, %s343_s2 }
  0x16   :  { %p232_p10 = pnand %p230_p9, %p227_p8 }
  0x18   :  { %235 = shalt.err (!%p232_p10)
}
  0x19   :  { %s236_s5 = scalar_lea.vmem %s29_s15, 128  ;;  %p241_p12 = scmp.lt.s32.totalorder %s29_s15, %s29_s15 }
  0x1a   :  { %p237_p11 = scmp.ne.s32.totalorder %s29_s15, %s236_s5  ;;  %p242_p13 = scmp.lt.s32.totalorder %s236_s5, %s236_s5 }
  0x1c   :  { %p243_p0 = por %p242_p13, %p241_p12 }
  0x1e   :  { %p244_p1 = pnand %p243_p0, %p237_p11 }
  0x20   :  { %247 = shalt.err (!%p244_p1)
}
  0x21   :  { %31 = dma.hbm_to_vmem [thread:$0]  %s343_s2, 128, %s29_s15, [#allocation8]  }
  0x22   :  { %270 = dma.done.wait [#allocation5], 128  }
  0x23   :  { %271 = vsyncadd [#allocation5], 4294967168 }
  0x24   :  { %272 = dma.done.wait [#allocation8], 128  }
  0x25   :  { %273 = vsyncadd [#allocation8], 4294967168  ;;  %v278_v0 = vmov 0.0   ;;  %vm279_vm0 = vmmov 0   ;;  %vm43_vm1 = vcmask 261120   ;;  %v39_v1 = vld [vmem:[#allocation7] sm:$0xff] }
  0x26   :  { %186 = vmatprep.subr.mxu0 %v278_v0  ;;  %188 = vmatprep.mubr.msk.f32.mxu0 %vm279_vm0, %v278_v0  ;;  %v38_v2 = vld [vmem:[#allocation4] sm:$0xff]  ;;  %vm124_vm2 = vcmask 64512   ;;  %v139_v13 = vmul.f32 %v39_v1, %v39_v1  ;;  %vm151_vm3 = vcmask 7168   ;;  %s280_s8 = smov [#allocation9]  }
  0x27   :  { %187 = vmatpush3.xpose.msk.msra.mxu0 %vm43_vm1, %v39_v1  ;;  %v120_v3 = vmul.f32 %v39_v1, %v38_v2  ;;  %v138_v14 = vmul.f32 %v38_v2, %v38_v2  ;;  %s172_s9 = sshll.u32 %s280_s8, 4  ;;  %s173_s9 = int_to_ptr.vmem [resolvable:$true] %s172_s9 }
  0x28   :  { %s248_s12 = scalar_lea.vmem %s173_s9, 128  ;;  %p253_p3 = scmp.lt.s32.totalorder %s173_s9, %s173_s9 }
  0x29   :  { %v121_v4 = vsel %vm43_vm1, %v120_v3, 0.0  ;;  %v140_v15 = vadd.f32 %v139_v13, %v138_v14  ;;  %p249_p2 = scmp.ne.s32.totalorder %s173_s9, %s248_s12  ;;  %p254_p4 = scmp.lt.s32.totalorder %s248_s12, %s248_s12 }
  0x2a   :  { %189 = vmatmul.mubr.msk.f32.vlgmr.msra.gmra.mrb[0].mxu0 %vm43_vm1, %v38_v2  ;;  %122 = vadd.xlane.f32.xlu1 %v121_v4 }
  0x2b   :  { %v141_v16 = vsel %vm43_vm1, %v140_v15, 0.0  ;;  %p255_p5 = por %p254_p4, %p253_p3 }
  0x2d   :  { %p256_p6 = pnand %p255_p5, %p249_p2 }
  0x2e   :  { %142 = vadd.xlane.f32.xlu1 %v141_v16 }
  0xb7   :  { %v123_v18 = vpop.xlane.xlu1 %122 }
  0xbb   :  { %v143_v24 = vpop.xlane.xlu1 %142 }
  0xbc   :  { %v144_v25 = vrot.slane %v143_v24, 4 }
  0xbe   :  { %v145_v26 = vadd.f32 %v144_v25, %v143_v24 }
  0xc0   :  { %v146_v27 = vrot.slane %v145_v26, 2 }
  0xc2   :  { %v147_v28 = vadd.f32 %v146_v27, %v145_v26 }
  0xc4   :  { %v148_v29 = vrot.slane %v147_v28, 1 }
  0xc6   :  { %v149_v30 = vadd.f32 %v148_v29, %v147_v28 }
  0xc8   :  { %191 = vpush %v149_v30 }
  0xf9   :  { %s192_s2 = spop %191 }
  0xfa   :  { %s162_s7 = smul.f32 0.02, %s192_s2 }
  0xfd   :  { %v116_v5 = vpop.f32.mrb[0].mxu0 }
  0xfe   :  { %v190_v6 = vpop.f32.mrb[1].mxu0  ;;  %v125_v7 = vsel %vm124_vm2, %v116_v5, -inf }
  0xff   :  { %126 = vmax.xlane.f32.xlu0 %v125_v7 }
 0x18c   :  { %v127_v8 = vpop.xlane.xlu0 %126 }
 0x18d   :  { %v128_v9 = vsub.f32 %v116_v5, %v127_v8  ;;  %v134_v20 = vsub.f32 %v127_v8, %v123_v18 }
 0x18f   :  { %v129_v10 = vmul.f32 1.442695, %v128_v9 }
 0x191   :  { %200 = vpow2.f32 %v129_v10 }
 0x19b   :  { %v201_v11 = vpop.eup %200 }
 0x19c   :  { %v131_v12 = vsel %vm124_vm2, %v201_v11, 0.0 }
 0x19d   :  { %132 = vadd.xlane.f32.xlu0 %v131_v12 }
 0x22a   :  { %v133_v17 = vpop.xlane.xlu0 %132 }
 0x22b   :  { %202 = vlog2.f32 %v133_v17 }
 0x235   :  { %v203_v19 = vpop.eup %202 }
 0x236   :  { %v136_v21 = vmul.f32 0.6931472, %v203_v19 }
 0x238   :  { %v137_v22 = vadd.f32 %v136_v21, %v134_v20 }
 0x23a   :  { %v152_v23 = vsel %vm151_vm3, %v137_v22, 0.0 }
 0x23b   :  { %153 = vadd.xlane.f32.xlu0 %v152_v23 }
 0x2c8   :  { %v154_v31 = vpop.xlane.xlu0 %153 }
 0x2c9   :  { %v155_v32 = vrot.slane %v154_v31, 4 }
 0x2cb   :  { %v156_v33 = vadd.f32 %v155_v32, %v154_v31 }
 0x2cd   :  { %v157_v34 = vrot.slane %v156_v33, 2 }
 0x2cf   :  { %v158_v35 = vadd.f32 %v157_v34, %v156_v33 }
 0x2d1   :  { %v159_v36 = vrot.slane %v158_v35, 1 }
 0x2d3   :  { %v160_v37 = vadd.f32 %v159_v36, %v158_v35 }
 0x2d5   :  { %193 = vpush %v160_v37 }
 0x306   :  { %s194_s10 = spop %193 }
 0x307   :  { %s163_s11 = sadd.f32 %s194_s10, %s162_s7 }
 0x309   :  { %v164_v38 = vstv %s163_s11 }
 0x30a   :  { %165 = vst [vmem:[#allocation9] sm:$0xff] %v164_v38 }
 0x30b   :  { %259 = shalt.err (!%p256_p6)
}
 0x30c   :  { %s260_s15 = scalar_lea.hbm %s344_s3, 128 }
 0x30d   :  { %p261_p7 = scmp.ne.s32.totalorder %s344_s3, %s260_s15  ;;  %p264_p8 = scmp.lt.u32.totalorder %s260_s15, %s344_s3 }
 0x30f   :  { %p266_p9 = pnand %p264_p8, %p261_p7 }
 0x311   :  { %269 = shalt.err (!%p266_p9)
}
 0x312   :  { %175 = dma.vmem_to_hbm [thread:$0]  %s173_s9, 128, %s344_s3, [#allocation6]  }
 0x313   :  { %274 = dma.done.wait [#allocation6], 128  }
 0x314   :  { %275 = vsyncadd [#allocation6], 4294967168 }
 0x315   :  { %179 = vsyncpa [#allocation5], 1 }
 0x316   :  { %180 = vsyncpa [#allocation8], 1 }
 0x317   :  { %181 = vsyncpa [#allocation6], 1 }

// kernel: tpu_custom_call.1
= control target key start
LH: loop header
LB: loop body
LE: loop exit
PB: predicated region body
PF: predicated region fallthrough
CT: control target
= control target key end

     0   :  { %9 = vsyncpa [#allocation5], 0  ;;  %s341_s0 = inlined_call_operand.<no memory space> [shape: s32[1], index: 0, kind: input, shape index: {}]   ;;  %s342_s1 = inlined_call_operand.hbm [shape: f32[8,32], index: 1, kind: input, shape index: {}]   ;;  %s343_s2 = inlined_call_operand.hbm [shape: f32[8,32], index: 2, kind: input, shape index: {}]   ;;  %s344_s3 = inlined_call_operand.hbm [shape: f32[1,8,128], index: 3, kind: output, shape index: {}]  }
   0x1   :  { %10 = vsyncpa [#allocation8], 0 }
   0x2   :  { %11 = vsyncpa [#allocation6], 0  ;;  %s276_s12 = smov [#allocation4]   ;;  %s277_s14 = smov [#allocation7]  }
   0x3   :  { %s18_s13 = sshll.u32 %s276_s12, 4  ;;  %s28_s15 = sshll.u32 %s277_s14, 4  ;;  %s19_s13 = int_to_ptr.vmem [resolvable:$true] %s18_s13  ;;  %s29_s15 = int_to_ptr.vmem [resolvable:$true] %s28_s15 }
   0x4   :  { %s204_s17 = scalar_lea.hbm %s342_s1, 128 }
   0x5   :  { %p205_p0 = scmp.ne.s32.totalorder %s342_s1, %s204_s17  ;;  %p208_p1 = scmp.lt.u32.totalorder %s204_s17, %s342_s1 }
   0x7   :  { %p210_p2 = pnand %p208_p1, %p205_p0 }
   0x9   :  { %213 = shalt.err (!%p210_p2)
}
   0xa   :  { %s214_s22 = scalar_lea.vmem %s19_s13, 128  ;;  %p219_p4 = scmp.lt.s32.totalorder %s19_s13, %s19_s13 }
   0xb   :  { %p215_p3 = scmp.ne.s32.totalorder %s19_s13, %s214_s22  ;;  %p220_p5 = scmp.lt.s32.totalorder %s214_s22, %s214_s22 }
   0xd   :  { %p221_p6 = por %p220_p5, %p219_p4 }
   0xf   :  { %p222_p7 = pnand %p221_p6, %p215_p3 }
  0x11   :  { %225 = shalt.err (!%p222_p7)
}
  0x12   :  { %21 = dma.hbm_to_vmem [thread:$0]  %s342_s1, 128, %s19_s13, [#allocation5]  }
  0x13   :  { %s226_s27 = scalar_lea.hbm %s343_s2, 128 }
  0x14   :  { %p227_p8 = scmp.ne.s32.totalorder %s343_s2, %s226_s27  ;;  %p230_p9 = scmp.lt.u32.totalorder %s226_s27, %s343_s2 }
  0x16   :  { %p232_p10 = pnand %p230_p9, %p227_p8 }
  0x18   :  { %235 = shalt.err (!%p232_p10)
}
  0x19   :  { %s236_s5 = scalar_lea.vmem %s29_s15, 128  ;;  %p241_p12 = scmp.lt.s32.totalorder %s29_s15, %s29_s15 }
  0x1a   :  { %p237_p11 = scmp.ne.s32.totalorder %s29_s15, %s236_s5  ;;  %p242_p13 = scmp.lt.s32.totalorder %s236_s5, %s236_s5 }
  0x1c   :  { %p243_p0 = por %p242_p13, %p241_p12 }
  0x1e   :  { %p244_p1 = pnand %p243_p0, %p237_p11 }
  0x20   :  { %247 = shalt.err (!%p244_p1)
}
  0x21   :  { %31 = dma.hbm_to_vmem [thread:$0]  %s343_s2, 128, %s29_s15, [#allocation8]  }
  0x22   :  { %270 = dma.done.wait [#allocation5], 128  }
  0x23   :  { %271 = vsyncadd [#allocation5], 4294967168 }
  0x24   :  { %272 = dma.done.wait [#allocation8], 128  }
  0x25   :  { %273 = vsyncadd [#allocation8], 4294967168  ;;  %v278_v0 = vmov 0.0   ;;  %vm279_vm0 = vmmov 0   ;;  %vm43_vm1 = vcmask 261120   ;;  %v39_v1 = vld [vmem:[#allocation7] sm:$0xff] }
  0x26   :  { %186 = vmatprep.subr.mxu0 %v278_v0  ;;  %188 = vmatprep.mubr.msk.f32.mxu0 %vm279_vm0, %v278_v0  ;;  %v38_v2 = vld [vmem:[#allocation4] sm:$0xff]  ;;  %vm124_vm2 = vcmask 64512   ;;  %v139_v13 = vmul.f32 %v39_v1, %v39_v1  ;;  %vm151_vm3 = vcmask 7168   ;;  %s280_s8 = smov [#allocation9]  }
  0x27   :  { %187 = vmatpush3.xpose.msk.msra.mxu0 %vm43_vm1, %v39_v1  ;;  %v120_v3 = vmul.f32 %v39_v1, %v38_v2  ;;  %v138_v14 = vmul.f32 %v38_v2, %v38_v2  ;;  %s172_s9 = sshll.u32 %s280_s8, 4  ;;  %s173_s9 = int_to_ptr.vmem [resolvable:$true] %s172_s9 }
  0x28   :  { %s248_s12 = scalar_lea.vmem %s173_s9, 128  ;;  %p253_p3 = scmp.lt.s32.totalorder %s173_s9, %s173_s9 }
  0x29   :  { %v121_v4 = vsel %vm43_vm1, %v120_v3, 0.0  ;;  %v140_v15 = vadd.f32 %v139_v13, %v138_v14  ;;  %p249_p2 = scmp.ne.s32.totalorder %s173_s9, %s248_s12  ;;  %p254_p4 = scmp.lt.s32.totalorder %s248_s12, %s248_s12 }
  0x2a   :  { %189 = vmatmul.mubr.msk.f32.vlgmr.msra.gmra.mrb[0].mxu0 %vm43_vm1, %v38_v2  ;;  %122 = vadd.xlane.f32.xlu1 %v121_v4 }
  0x2b   :  { %v141_v16 = vsel %vm43_vm1, %v140_v15, 0.0  ;;  %p255_p5 = por %p254_p4, %p253_p3 }
  0x2d   :  { %p256_p6 = pnand %p255_p5, %p249_p2 }
  0x2e   :  { %142 = vadd.xlane.f32.xlu1 %v141_v16 }
  0xb7   :  { %v123_v18 = vpop.xlane.xlu1 %122 }
  0xbb   :  { %v143_v24 = vpop.xlane.xlu1 %142 }
  0xbc   :  { %v144_v25 = vrot.slane %v143_v24, 4 }
  0xbe   :  { %v145_v26 = vadd.f32 %v144_v25, %v143_v24 }
  0xc0   :  { %v146_v27 = vrot.slane %v145_v26, 2 }
  0xc2   :  { %v147_v28 = vadd.f32 %v146_v27, %v145_v26 }
  0xc4   :  { %v148_v29 = vrot.slane %v147_v28, 1 }
  0xc6   :  { %v149_v30 = vadd.f32 %v148_v29, %v147_v28 }
  0xc8   :  { %191 = vpush %v149_v30 }
  0xf9   :  { %s192_s2 = spop %191 }
  0xfa   :  { %s162_s7 = smul.f32 0.02, %s192_s2 }
  0xfd   :  { %v116_v5 = vpop.f32.mrb[0].mxu0 }
  0xfe   :  { %v190_v6 = vpop.f32.mrb[1].mxu0  ;;  %v125_v7 = vsel %vm124_vm2, %v116_v5, -inf }
  0xff   :  { %126 = vmax.xlane.f32.xlu0 %v125_v7 }
 0x18c   :  { %v127_v8 = vpop.xlane.xlu0 %126 }
 0x18d   :  { %v128_v9 = vsub.f32 %v116_v5, %v127_v8  ;;  %v134_v20 = vsub.f32 %v127_v8, %v123_v18 }
 0x18f   :  { %v129_v10 = vmul.f32 1.442695, %v128_v9 }
 0x191   :  { %200 = vpow2.f32 %v129_v10 }
 0x19b   :  { %v201_v11 = vpop.eup %200 }
 0x19c   :  { %v131_v12 = vsel %vm124_vm2, %v201_v11, 0.0 }
 0x19d   :  { %132 = vadd.xlane.f32.xlu0 %v131_v12 }
 0x22a   :  { %v133_v17 = vpop.xlane.xlu0 %132 }
 0x22b   :  { %202 = vlog2.f32 %v133_v17 }
 0x235   :  { %v203_v19 = vpop.eup %202 }
 0x236   :  { %v136_v21 = vmul.f32 0.6931472, %v203_v19 }
 0x238   :  { %v137_v22 = vadd.f32 %v136_v21, %v134_v20 }
 0x23a   :  { %v152_v23 = vsel %vm151_vm3, %v137_v22, 0.0 }
 0x23b   :  { %153 = vadd.xlane.f32.xlu0 %v152_v23 }
 0x2c8   :  { %v154_v31 = vpop.xlane.xlu0 %153 }
 0x2c9   :  { %v155_v32 = vrot.slane %v154_v31, 4 }
 0x2cb   :  { %v156_v33 = vadd.f32 %v155_v32, %v154_v31 }
 0x2cd   :  { %v157_v34 = vrot.slane %v156_v33, 2 }
 0x2cf   :  { %v158_v35 = vadd.f32 %v157_v34, %v156_v33 }
 0x2d1   :  { %v159_v36 = vrot.slane %v158_v35, 1 }
 0x2d3   :  { %v160_v37 = vadd.f32 %v159_v36, %v158_v35 }
 0x2d5   :  { %193 = vpush %v160_v37 }
 0x306   :  { %s194_s10 = spop %193 }
 0x307   :  { %s163_s11 = sadd.f32 %s194_s10, %s162_s7 }
 0x309   :  { %v164_v38 = vstv %s163_s11 }
 0x30a   :  { %165 = vst [vmem:[#allocation9] sm:$0xff] %v164_v38 }
 0x30b   :  { %259 = shalt.err (!%p256_p6)
}
 0x30c   :  { %s260_s15 = scalar_lea.hbm %s344_s3, 128 }
 0x30d   :  { %p261_p7 = scmp.ne.s32.totalorder %s344_s3, %s260_s15  ;;  %p264_p8 = scmp.lt.u32.totalorder %s260_s15, %s344_s3 }
 0x30f   :  { %p266_p9 = pnand %p264_p8, %p261_p7 }
 0x311   :  { %269 = shalt.err (!%p266_p9)
}
 0x312   :  { %175 = dma.vmem_to_hbm [thread:$0]  %s173_s9, 128, %s344_s3, [#allocation6]  }
 0x313   :  { %274 = dma.done.wait [#allocation6], 128  }
 0x314   :  { %275 = vsyncadd [#allocation6], 4294967168 }
 0x315   :  { %179 = vsyncpa [#allocation5], 1 }
 0x316   :  { %180 = vsyncpa [#allocation8], 1 }
 0x317   :  { %181 = vsyncpa [#allocation6], 1 }

</bundles_post_ra>
